<compile_context>
chip_gen: v7x
topology: tpu7x:2x2x1
jax: 0.10.0
libtpu: 0.0.40
codegen_flags: <defaults>
</compile_context>

<pallas_src>
import functools

import jax
import jax.numpy as jnp
from jax import lax
from jax.experimental import pallas as pl
from jax.experimental.pallas import tpu as pltpu


def _leaky_relu(x, slope=0.2):
    return jnp.where(x > 0, x, slope * x)


def _sigmoid(x):
    # Numerically stable sigmoid; exp runs on the EUP.
    z = jnp.exp(-jnp.abs(x))
    p = pl.reciprocal(1.0 + z, approx=False)
    return jnp.where(x >= 0, p, 1.0 - p)


def _round_up(a, b):
    return (a + b - 1) // b * b


# --------------------------------------------------------------------------
# Pass 1: accumulate per-batch per-channel sum / sum-of-squares of
#         h2 = conv2(lrelu(conv1(x)))  for BatchNorm batch statistics.
# --------------------------------------------------------------------------
def _stats_kernel(hw_true, tile, needs_mask,
                  x_ref, w1_ref, b1_ref, w2_ref, b2_ref, stats_ref):
    # stats_ref is resident across the pixel-tile ("arbitrary") grid axis and
    # re-selected per batch index -> init at the first tile of each batch.
    @pl.when(pl.program_id(1) == 0)
    def _():
        stats_ref[...] = jnp.zeros_like(stats_ref)

    x = x_ref[...]                                            # (C_in, T)
    h1 = jnp.dot(w1_ref[...], x,
                 preferred_element_type=jnp.float32) + b1_ref[...]
    h1 = _leaky_relu(h1)
    h2 = jnp.dot(w2_ref[...], h1,
                 preferred_element_type=jnp.float32) + b2_ref[...]

    if needs_mask:
        # Mask padded pixel columns so the BN statistics stay exact.
        lane = lax.broadcasted_iota(jnp.int32, h2.shape, 1)
        pix = pl.program_id(1) * tile + lane
        h2 = jnp.where(pix < hw_true, h2, 0.0)

    stats_ref[:, 0:1] += jnp.sum(h2, axis=1, keepdims=True)
    stats_ref[:, 1:2] += jnp.sum(h2 * h2, axis=1, keepdims=True)


# --------------------------------------------------------------------------
# Pass 2: full forward per pixel tile with BatchNorm folded into conv2.
# --------------------------------------------------------------------------
def _fwd_kernel(x_ref, w1_ref, b1_ref, w2_ref, b2_ref, w3_ref, b3_ref, o_ref):
    x = x_ref[...]                                            # (C_in, T)
    h1 = jnp.dot(w1_ref[...], x,
                 preferred_element_type=jnp.float32) + b1_ref[...]
    h1 = _leaky_relu(h1)
    h2 = jnp.dot(w2_ref[...], h1,
                 preferred_element_type=jnp.float32) + b2_ref[...]
    h2 = _leaky_relu(h2)                                      # BN already folded
    h3 = jnp.dot(w3_ref[...], h2,
                 preferred_element_type=jnp.float32) + b3_ref[...]
    o_ref[...] = _sigmoid(h3)                                 # (1, T) lane-dense


# --------------------------------------------------------------------------
# Wrapper
# --------------------------------------------------------------------------
@functools.partial(jax.jit, static_argnames=("tile_hw",))
def discriminator_forward(x_nchw, params, tile_hw=None, eps=1e-5):
    """x_nchw: (N, C_in, H, W) float32 -> (N, 1, H, W) float32."""
    n, c_in, h, w = x_nchw.shape
    hw = h * w
    w1, b1, w2, b2, w3, b3 = params          # torch layout: w (out, in), b (out, 1)
    c2 = w2.shape[0]

    if tile_hw is None:
        tile_hw = min(2048, _round_up(hw, 128))
    tile_hw = _round_up(tile_hw, 128)
    hw_pad = _round_up(hw, tile_hw)
    n_tiles = hw_pad // tile_hw
    needs_mask = hw_pad != hw

    x3 = x_nchw.reshape(n, c_in, hw)         # no transpose, contiguous reshape
    if needs_mask:
        x3 = jnp.pad(x3, ((0, 0), (0, 0), (0, hw_pad - hw)))

    grid = (n, n_tiles)
    # Leading (batch) dim is squeezed out of the kernel view.
    x_spec = pl.BlockSpec((None, c_in, tile_hw), lambda i, j: (i, 0, j))

    def _const_spec(shape):
        return pl.BlockSpec(shape, lambda i, j: (0,) * len(shape))

    # ---- pass 1: per-batch BN partial statistics (batch axis parallel) ----
    stats = pl.pallas_call(
        functools.partial(_stats_kernel, hw, tile_hw, needs_mask),
        out_shape=jax.ShapeDtypeStruct((n, c2, 2), jnp.float32),
        grid=grid,
        in_specs=[x_spec,
                  _const_spec(w1.shape), _const_spec(b1.shape),
                  _const_spec(w2.shape), _const_spec(b2.shape)],
        out_specs=pl.BlockSpec((None, c2, 2), lambda i, j: (i, 0, 0)),
        compiler_params=pltpu.CompilerParams(
            dimension_semantics=("parallel", "arbitrary")),
    )(x3, w1, b1, w2, b2)

    m_total = float(n * hw)
    stats = jnp.sum(stats, axis=0)                             # (c2, 2)
    mean = stats[:, 0:1] / m_total
    var = jnp.maximum(stats[:, 1:2] / m_total - mean * mean, 0.0)  # biased var
    inv_std = lax.rsqrt(var + eps)            # BN gamma=1, beta=0 (_init_weight)
    w2f = w2 * inv_std
    b2f = (b2 - mean) * inv_std

    # ---- pass 2: conv1 + conv2(+BN folded) + LeakyReLU + conv3 + sigmoid ----
    out = pl.pallas_call(
        _fwd_kernel,
        out_shape=jax.ShapeDtypeStruct((n, 1, hw_pad), jnp.float32),
        grid=grid,
        in_specs=[x_spec,
                  _const_spec(w1.shape), _const_spec(b1.shape),
                  _const_spec(w2f.shape), _const_spec(b2f.shape),
                  _const_spec(w3.shape), _const_spec(b3.shape)],
        out_specs=pl.BlockSpec((None, 1, tile_hw), lambda i, j: (i, 0, j)),
        compiler_params=pltpu.CompilerParams(
            dimension_semantics=("parallel", "parallel")),
    )(x3, w1, b1, w2f, b2f, w3, b3)

    return out[:, :, :hw].reshape(n, 1, h, w)


# --------------------------------------------------------------------------
# Parameter init (matches the PyTorch module's shapes / init scheme)
# --------------------------------------------------------------------------
def init_params(key, in_planes, planes):
    k1, k2, k3, kb1, kb2, kb3 = jax.random.split(key, 6)

    def kaiming(k, fan_out, fan_in):               # kaiming_normal_, fan_in mode
        std = (2.0 / fan_in) ** 0.5
        return jax.random.normal(k, (fan_out, fan_in), jnp.float32) * std

    def bias(k, fan_out, fan_in):                  # torch conv default bias init
        bound = 1.0 / (fan_in ** 0.5)
        return jax.random.uniform(k, (fan_out, 1), jnp.float32, -bound, bound)

    p2 = planes * 2
    w1 = kaiming(k1, planes, in_planes)
    b1 = bias(kb1, planes, in_planes)
    w2 = kaiming(k2, p2, planes)
    b2 = bias(kb2, p2, planes)
    w3 = kaiming(k3, 1, p2)
    b3 = bias(kb3, 1, p2)
    return (w1, b1, w2, b2, w3, b3)


# --------------------------------------------------------------------------
# Pure-JAX reference for correctness checking
# --------------------------------------------------------------------------
def _reference_forward(x_nchw, params, eps=1e-5):
    n, c, h, w = x_nchw.shape
    w1, b1, w2, b2, w3, b3 = params
    xf = x_nchw.reshape(n, c, h * w)
    h1 = jnp.einsum('oc,ncp->nop', w1, xf) + b1[None]
    h1 = jnp.where(h1 > 0, h1, 0.2 * h1)
    h2 = jnp.einsum('oc,ncp->nop', w2, h1) + b2[None]
    mean = jnp.mean(h2, axis=(0, 2), keepdims=True)
    var = jnp.mean((h2 - mean) ** 2, axis=(0, 2), keepdims=True)
    h2 = (h2 - mean) * lax.rsqrt(var + eps)
    h2 = jnp.where(h2 > 0, h2, 0.2 * h2)
    h3 = jnp.einsum('oc,ncp->nop', w3, h2) + b3[None]
    return jax.nn.sigmoid(h3).reshape(n, 1, h, w)


if __name__ == "__main__":
    key = jax.random.PRNGKey(0)
    kx, kp = jax.random.split(key)

    N, C_IN, H, W = 2, 4, 16, 16
    PLANES = 8

    x = jax.random.normal(kx, (N, C_IN, H, W), jnp.float32)
    params = init_params(kp, C_IN, PLANES)

    # tile_hw=128 -> grid (N=2, tiles=2): exercises the stats accumulator path.
    out = discriminator_forward(x, params, tile_hw=128)
    out = jax.block_until_ready(out)

    ref = _reference_forward(x, params)

    assert out.shape == (N, 1, H, W), out.shape
    assert bool(jnp.all((out >= 0.0) & (out <= 1.0)))
    assert bool(jnp.allclose(out, ref, atol=1e-4, rtol=1e-4)), \
        float(jnp.max(jnp.abs(out - ref)))

    # Also exercise the default (large-tile) path.
    out2 = jax.block_until_ready(discriminator_forward(x, params))
    assert bool(jnp.allclose(out2, ref, atol=1e-4, rtol=1e-4)), \
        float(jnp.max(jnp.abs(out2 - ref)))

    print("KERNEL_OK")
</pallas_src>

<mosaic_0001>
module attributes {stable_mosaic.version = 11 : i64} {
  func.func @_stats_kernel(%arg0: i32, %arg1: i32, %arg2: memref<1x4x128xf32, #tpu.memory_space<vmem>>, %arg3: memref<8x4xf32, #tpu.memory_space<vmem>>, %arg4: memref<8x1xf32, #tpu.memory_space<vmem>>, %arg5: memref<16x8xf32, #tpu.memory_space<vmem>>, %arg6: memref<16x1xf32, #tpu.memory_space<vmem>>, %arg7: memref<1x16x2xf32, #tpu.memory_space<vmem>>) attributes {dimension_semantics = [#tpu.dimension_semantics<parallel>, #tpu.dimension_semantics<arbitrary>], iteration_bounds = array<i64: 2, 2>, scalar_prefetch = 0 : i64, scratch_operands = 0 : i64, tpu.core_type = #tpu.core_type<tc>, window_params = [{transform_indices = @transform_0, window_bounds = array<i64: 1, 4, 128>}, {pipeline_mode = #tpu.pipeline_mode<synchronous>, transform_indices = @transform_1, window_bounds = array<i64: 8, 4>}, {pipeline_mode = #tpu.pipeline_mode<synchronous>, transform_indices = @transform_2, window_bounds = array<i64: 8, 1>}, {pipeline_mode = #tpu.pipeline_mode<synchronous>, transform_indices = @transform_3, window_bounds = array<i64: 16, 8>}, {pipeline_mode = #tpu.pipeline_mode<synchronous>, transform_indices = @transform_4, window_bounds = array<i64: 16, 1>}, {transform_indices = @transform_5, window_bounds = array<i64: 1, 16, 2>}]} {
    %c0_i32 = arith.constant 0 : i32
    %0 = arith.cmpi eq, %arg1, %c0_i32 : i32
    %1 = arith.extui %0 : i1 to i32
    %c0_i32_0 = arith.constant 0 : i32
    %2 = arith.cmpi ne, %1, %c0_i32_0 : i32
    scf.if %2 {
      %cst_27 = arith.constant 0.000000e+00 : f32
      %37 = vector.broadcast %cst_27 : f32 to vector<16x2xf32>
      %c0_28 = arith.constant 0 : index
      %c0_29 = arith.constant 0 : index
      %c0_30 = arith.constant 0 : index
      %38 = vector.load %arg7[%c0_28, %c0_29, %c0_30] : memref<1x16x2xf32, #tpu.memory_space<vmem>>, vector<1x16x2xf32>
      %39 = vector.shape_cast %38 : vector<1x16x2xf32> to vector<16x2xf32>
      %40 = vector.shape_cast %37 : vector<16x2xf32> to vector<1x16x2xf32>
      tpu.vector_store %arg7[%c0_28, %c0_29, %c0_30], %40 {strides = array<i32>} : memref<1x16x2xf32, #tpu.memory_space<vmem>>, vector<1x16x2xf32>,
    } else {
    }
    %c0 = arith.constant 0 : index
    %c0_1 = arith.constant 0 : index
    %c0_2 = arith.constant 0 : index
    %3 = vector.load %arg2[%c0, %c0_1, %c0_2] : memref<1x4x128xf32, #tpu.memory_space<vmem>>, vector<1x4x128xf32>
    %4 = vector.shape_cast %3 : vector<1x4x128xf32> to vector<4x128xf32>
    %c0_3 = arith.constant 0 : index
    %c0_4 = arith.constant 0 : index
    %5 = vector.load %arg3[%c0_3, %c0_4] : memref<8x4xf32, #tpu.memory_space<vmem>>, vector<8x4xf32>
    %cst = arith.constant dense<0.000000e+00> : vector<8x128xf32>
    %6 = tpu.matmul %5, %4, %cst {dimension_numbers = #tpu.dot_dimension_numbers<[1], [0], [0], [1], [0, 0, 1, 1], [], []>} : vector<8x4xf32>, vector<4x128xf32>, vector<8x128xf32> -> vector<8x128xf32>
    %c0_5 = arith.constant 0 : index
    %c0_6 = arith.constant 0 : index
    %7 = vector.load %arg4[%c0_5, %c0_6] : memref<8x1xf32, #tpu.memory_space<vmem>>, vector<8x1xf32>
    %8 = vector.broadcast %7 : vector<8x1xf32> to vector<8x128xf32>
    %9 = arith.addf %6, %8 : vector<8x128xf32>
    %cst_7 = arith.constant 0.000000e+00 : f32
    %10 = vector.broadcast %cst_7 : f32 to vector<8x128xf32>
    %11 = arith.cmpf ogt, %9, %10 : vector<8x128xf32>
    %cst_8 = arith.constant 2.000000e-01 : f32
    %12 = vector.broadcast %cst_8 : f32 to vector<8x128xf32>
    %13 = arith.mulf %12, %9 : vector<8x128xf32>
    %14 = arith.select %11, %9, %13 : vector<8x128xi1>, vector<8x128xf32>
    %c0_9 = arith.constant 0 : index
    %c0_10 = arith.constant 0 : index
    %15 = vector.load %arg5[%c0_9, %c0_10] : memref<16x8xf32, #tpu.memory_space<vmem>>, vector<16x8xf32>
    %cst_11 = arith.constant dense<0.000000e+00> : vector<16x128xf32>
    %16 = tpu.matmul %15, %14, %cst_11 {dimension_numbers = #tpu.dot_dimension_numbers<[1], [0], [0], [1], [0, 0, 1, 1], [], []>} : vector<16x8xf32>, vector<8x128xf32>, vector<16x128xf32> -> vector<16x128xf32>
    %c0_12 = arith.constant 0 : index
    %c0_13 = arith.constant 0 : index
    %17 = vector.load %arg6[%c0_12, %c0_13] : memref<16x1xf32, #tpu.memory_space<vmem>>, vector<16x1xf32>
    %18 = vector.broadcast %17 : vector<16x1xf32> to vector<16x128xf32>
    %19 = arith.addf %16, %18 : vector<16x128xf32>
    %c0_14 = arith.constant 0 : index
    %c0_15 = arith.constant 0 : index
    %c0_16 = arith.constant 0 : index
    %20 = vector.load %arg7[%c0_14, %c0_15, %c0_16] : memref<1x16x2xf32, #tpu.memory_space<vmem>>, vector<1x16x1xf32>
    %21 = vector.shape_cast %20 : vector<1x16x1xf32> to vector<16x1xf32>
    %cst_17 = arith.constant dense<0.000000e+00> : vector<16xf32>
    %22 = vector.multi_reduction <add>, %19, %cst_17 [1] : vector<16x128xf32> to vector<16xf32>
    %23 = vector.shape_cast %22 : vector<16xf32> to vector<16x1xf32>
    %24 = arith.addf %21, %23 : vector<16x1xf32>
    %c0_18 = arith.constant 0 : index
    %c0_19 = arith.constant 0 : index
    %c0_20 = arith.constant 0 : index
    %25 = vector.load %arg7[%c0_18, %c0_19, %c0_20] : memref<1x16x2xf32, #tpu.memory_space<vmem>>, vector<1x16x1xf32>
    %26 = vector.shape_cast %25 : vector<1x16x1xf32> to vector<16x1xf32>
    %27 = vector.shape_cast %24 : vector<16x1xf32> to vector<1x16x1xf32>
    tpu.vector_store %arg7[%c0_18, %c0_19, %c0_20], %27 {strides = array<i32>} : memref<1x16x2xf32, #tpu.memory_space<vmem>>, vector<1x16x1xf32>,
    %c0_21 = arith.constant 0 : index
    %c0_22 = arith.constant 0 : index
    %c1 = arith.constant 1 : index
    %28 = vector.load %arg7[%c0_21, %c0_22, %c1] : memref<1x16x2xf32, #tpu.memory_space<vmem>>, vector<1x16x1xf32>
    %29 = vector.shape_cast %28 : vector<1x16x1xf32> to vector<16x1xf32>
    %30 = arith.mulf %19, %19 : vector<16x128xf32>
    %cst_23 = arith.constant dense<0.000000e+00> : vector<16xf32>
    %31 = vector.multi_reduction <add>, %30, %cst_23 [1] : vector<16x128xf32> to vector<16xf32>
    %32 = vector.shape_cast %31 : vector<16xf32> to vector<16x1xf32>
    %33 = arith.addf %29, %32 : vector<16x1xf32>
    %c0_24 = arith.constant 0 : index
    %c0_25 = arith.constant 0 : index
    %c1_26 = arith.constant 1 : index
    %34 = vector.load %arg7[%c0_24, %c0_25, %c1_26] : memref<1x16x2xf32, #tpu.memory_space<vmem>>, vector<1x16x1xf32>
    %35 = vector.shape_cast %34 : vector<1x16x1xf32> to vector<16x1xf32>
    %36 = vector.shape_cast %33 : vector<16x1xf32> to vector<1x16x1xf32>
    tpu.vector_store %arg7[%c0_24, %c0_25, %c1_26], %36 {strides = array<i32>} : memref<1x16x2xf32, #tpu.memory_space<vmem>>, vector<1x16x1xf32>,
    return
  }
  func.func @transform_0(%arg0: i32, %arg1: i32) -> (i32, i32, i32) {
    %c0_i32 = arith.constant 0 : i32
    %c0_i32_0 = arith.constant 0 : i32
    return %arg0, %c0_i32, %arg1 : i32, i32, i32
  }
  func.func @transform_1(%arg0: i32, %arg1: i32) -> (i32, i32) {
    %c0_i32 = arith.constant 0 : i32
    %c0_i32_0 = arith.constant 0 : i32
    %c0_i32_1 = arith.constant 0 : i32
    return %c0_i32, %c0_i32_0 : i32, i32
  }
  func.func @transform_2(%arg0: i32, %arg1: i32) -> (i32, i32) {
    %c0_i32 = arith.constant 0 : i32
    %c0_i32_0 = arith.constant 0 : i32
    %c0_i32_1 = arith.constant 0 : i32
    return %c0_i32, %c0_i32_0 : i32, i32
  }
  func.func @transform_3(%arg0: i32, %arg1: i32) -> (i32, i32) {
    %c0_i32 = arith.constant 0 : i32
    %c0_i32_0 = arith.constant 0 : i32
    %c0_i32_1 = arith.constant 0 : i32
    return %c0_i32, %c0_i32_0 : i32, i32
  }
  func.func @transform_4(%arg0: i32, %arg1: i32) -> (i32, i32) {
    %c0_i32 = arith.constant 0 : i32
    %c0_i32_0 = arith.constant 0 : i32
    %c0_i32_1 = arith.constant 0 : i32
    return %c0_i32, %c0_i32_0 : i32, i32
  }
  func.func @transform_5(%arg0: i32, %arg1: i32) -> (i32, i32, i32) {
    %c0_i32 = arith.constant 0 : i32
    %c0_i32_0 = arith.constant 0 : i32
    %c0_i32_1 = arith.constant 0 : i32
    return %arg0, %c0_i32, %c0_i32_0 : i32, i32, i32
  }
}

module attributes {stable_mosaic.version = 11 : i64} {
  func.func @_fwd_kernel(%arg0: i32, %arg1: i32, %arg2: memref<1x4x128xf32, #tpu.memory_space<vmem>>, %arg3: memref<8x4xf32, #tpu.memory_space<vmem>>, %arg4: memref<8x1xf32, #tpu.memory_space<vmem>>, %arg5: memref<16x8xf32, #tpu.memory_space<vmem>>, %arg6: memref<16x1xf32, #tpu.memory_space<vmem>>, %arg7: memref<1x16xf32, #tpu.memory_space<vmem>>, %arg8: memref<1x1xf32, #tpu.memory_space<vmem>>, %arg9: memref<1x1x128xf32, #tpu.memory_space<vmem>>) attributes {dimension_semantics = [#tpu.dimension_semantics<parallel>, #tpu.dimension_semantics<parallel>], iteration_bounds = array<i64: 2, 2>, scalar_prefetch = 0 : i64, scratch_operands = 0 : i64, tpu.core_type = #tpu.core_type<tc>, window_params = [{transform_indices = @transform_0, window_bounds = array<i64: 1, 4, 128>}, {pipeline_mode = #tpu.pipeline_mode<synchronous>, transform_indices = @transform_1, window_bounds = array<i64: 8, 4>}, {pipeline_mode = #tpu.pipeline_mode<synchronous>, transform_indices = @transform_2, window_bounds = array<i64: 8, 1>}, {pipeline_mode = #tpu.pipeline_mode<synchronous>, transform_indices = @transform_3, window_bounds = array<i64: 16, 8>}, {pipeline_mode = #tpu.pipeline_mode<synchronous>, transform_indices = @transform_4, window_bounds = array<i64: 16, 1>}, {pipeline_mode = #tpu.pipeline_mode<synchronous>, transform_indices = @transform_5, window_bounds = array<i64: 1, 16>}, {pipeline_mode = #tpu.pipeline_mode<synchronous>, transform_indices = @transform_6, window_bounds = array<i64: 1, 1>}, {transform_indices = @transform_7, window_bounds = array<i64: 1, 1, 128>}]} {
    %c0 = arith.constant 0 : index
    %c0_0 = arith.constant 0 : index
    %c0_1 = arith.constant 0 : index
    %0 = vector.load %arg2[%c0, %c0_0, %c0_1] : memref<1x4x128xf32, #tpu.memory_space<vmem>>, vector<1x4x128xf32>
    %1 = vector.shape_cast %0 : vector<1x4x128xf32> to vector<4x128xf32>
    %c0_2 = arith.constant 0 : index
    %c0_3 = arith.constant 0 : index
    %2 = vector.load %arg3[%c0_2, %c0_3] : memref<8x4xf32, #tpu.memory_space<vmem>>, vector<8x4xf32>
    %cst = arith.constant dense<0.000000e+00> : vector<8x128xf32>
    %3 = tpu.matmul %2, %1, %cst {dimension_numbers = #tpu.dot_dimension_numbers<[1], [0], [0], [1], [0, 0, 1, 1], [], []>} : vector<8x4xf32>, vector<4x128xf32>, vector<8x128xf32> -> vector<8x128xf32>
    %c0_4 = arith.constant 0 : index
    %c0_5 = arith.constant 0 : index
    %4 = vector.load %arg4[%c0_4, %c0_5] : memref<8x1xf32, #tpu.memory_space<vmem>>, vector<8x1xf32>
    %5 = vector.broadcast %4 : vector<8x1xf32> to vector<8x128xf32>
    %6 = arith.addf %3, %5 : vector<8x128xf32>
    %cst_6 = arith.constant 0.000000e+00 : f32
    %7 = vector.broadcast %cst_6 : f32 to vector<8x128xf32>
    %8 = arith.cmpf ogt, %6, %7 : vector<8x128xf32>
    %cst_7 = arith.constant 2.000000e-01 : f32
    %9 = vector.broadcast %cst_7 : f32 to vector<8x128xf32>
    %10 = arith.mulf %9, %6 : vector<8x128xf32>
    %11 = arith.select %8, %6, %10 : vector<8x128xi1>, vector<8x128xf32>
    %c0_8 = arith.constant 0 : index
    %c0_9 = arith.constant 0 : index
    %12 = vector.load %arg5[%c0_8, %c0_9] : memref<16x8xf32, #tpu.memory_space<vmem>>, vector<16x8xf32>
    %cst_10 = arith.constant dense<0.000000e+00> : vector<16x128xf32>
    %13 = tpu.matmul %12, %11, %cst_10 {dimension_numbers = #tpu.dot_dimension_numbers<[1], [0], [0], [1], [0, 0, 1, 1], [], []>} : vector<16x8xf32>, vector<8x128xf32>, vector<16x128xf32> -> vector<16x128xf32>
    %c0_11 = arith.constant 0 : index
    %c0_12 = arith.constant 0 : index
    %14 = vector.load %arg6[%c0_11, %c0_12] : memref<16x1xf32, #tpu.memory_space<vmem>>, vector<16x1xf32>
    %15 = vector.broadcast %14 : vector<16x1xf32> to vector<16x128xf32>
    %16 = arith.addf %13, %15 : vector<16x128xf32>
    %cst_13 = arith.constant 0.000000e+00 : f32
    %17 = vector.broadcast %cst_13 : f32 to vector<16x128xf32>
    %18 = arith.cmpf ogt, %16, %17 : vector<16x128xf32>
    %cst_14 = arith.constant 2.000000e-01 : f32
    %19 = vector.broadcast %cst_14 : f32 to vector<16x128xf32>
    %20 = arith.mulf %19, %16 : vector<16x128xf32>
    %21 = arith.select %18, %16, %20 : vector<16x128xi1>, vector<16x128xf32>
    %c0_15 = arith.constant 0 : index
    %c0_16 = arith.constant 0 : index
    %22 = vector.load %arg7[%c0_15, %c0_16] : memref<1x16xf32, #tpu.memory_space<vmem>>, vector<1x16xf32>
    %cst_17 = arith.constant dense<0.000000e+00> : vector<1x128xf32>
    %23 = tpu.matmul %22, %21, %cst_17 {dimension_numbers = #tpu.dot_dimension_numbers<[1], [0], [0], [1], [0, 0, 1, 1], [], []>} : vector<1x16xf32>, vector<16x128xf32>, vector<1x128xf32> -> vector<1x128xf32>
    %c0_18 = arith.constant 0 : index
    %c0_19 = arith.constant 0 : index
    %24 = vector.load %arg8[%c0_18, %c0_19] : memref<1x1xf32, #tpu.memory_space<vmem>>, vector<1x1xf32>
    %25 = vector.broadcast %24 : vector<1x1xf32> to vector<1x128xf32>
    %26 = arith.addf %23, %25 : vector<1x128xf32>
    %27 = math.absf %26 : vector<1x128xf32>
    %cst_20 = arith.constant 0.000000e+00 : f32
    %28 = vector.broadcast %cst_20 : f32 to vector<1x128xf32>
    %29 = arith.subf %28, %27 : vector<1x128xf32>
    %30 = math.exp %29 : vector<1x128xf32>
    %cst_21 = arith.constant 1.000000e+00 : f32
    %31 = vector.broadcast %cst_21 : f32 to vector<1x128xf32>
    %32 = arith.addf %31, %30 : vector<1x128xf32>
    %33 = tpu.reciprocal %32 : vector<1x128xf32> -> vector<1x128xf32>
    %cst_22 = arith.constant 0.000000e+00 : f32
    %34 = vector.broadcast %cst_22 : f32 to vector<1x128xf32>
    %35 = arith.cmpf oge, %26, %34 : vector<1x128xf32>
    %cst_23 = arith.constant 1.000000e+00 : f32
    %36 = vector.broadcast %cst_23 : f32 to vector<1x128xf32>
    %37 = arith.subf %36, %33 : vector<1x128xf32>
    %38 = arith.select %35, %33, %37 : vector<1x128xi1>, vector<1x128xf32>
    %c0_24 = arith.constant 0 : index
    %c0_25 = arith.constant 0 : index
    %c0_26 = arith.constant 0 : index
    %39 = vector.load %arg9[%c0_24, %c0_25, %c0_26] : memref<1x1x128xf32, #tpu.memory_space<vmem>>, vector<1x1x128xf32>
    %40 = vector.shape_cast %39 : vector<1x1x128xf32> to vector<1x128xf32>
    %41 = vector.shape_cast %38 : vector<1x128xf32> to vector<1x1x128xf32>
    tpu.vector_store %arg9[%c0_24, %c0_25, %c0_26], %41 {strides = array<i32>} : memref<1x1x128xf32, #tpu.memory_space<vmem>>, vector<1x1x128xf32>,
    return
  }
  func.func @transform_0(%arg0: i32, %arg1: i32) -> (i32, i32, i32) {
    %c0_i32 = arith.constant 0 : i32
    %c0_i32_0 = arith.constant 0 : i32
    return %arg0, %c0_i32, %arg1 : i32, i32, i32
  }
  func.func @transform_1(%arg0: i32, %arg1: i32) -> (i32, i32) {
    %c0_i32 = arith.constant 0 : i32
    %c0_i32_0 = arith.constant 0 : i32
    %c0_i32_1 = arith.constant 0 : i32
    return %c0_i32, %c0_i32_0 : i32, i32
  }
  func.func @transform_2(%arg0: i32, %arg1: i32) -> (i32, i32) {
    %c0_i32 = arith.constant 0 : i32
    %c0_i32_0 = arith.constant 0 : i32
    %c0_i32_1 = arith.constant 0 : i32
    return %c0_i32, %c0_i32_0 : i32, i32
  }
  func.func @transform_3(%arg0: i32, %arg1: i32) -> (i32, i32) {
    %c0_i32 = arith.constant 0 : i32
    %c0_i32_0 = arith.constant 0 : i32
    %c0_i32_1 = arith.constant 0 : i32
    return %c0_i32, %c0_i32_0 : i32, i32
  }
  func.func @transform_4(%arg0: i32, %arg1: i32) -> (i32, i32) {
    %c0_i32 = arith.constant 0 : i32
    %c0_i32_0 = arith.constant 0 : i32
    %c0_i32_1 = arith.constant 0 : i32
    return %c0_i32, %c0_i32_0 : i32, i32
  }
  func.func @transform_5(%arg0: i32, %arg1: i32) -> (i32, i32) {
    %c0_i32 = arith.constant 0 : i32
    %c0_i32_0 = arith.constant 0 : i32
    %c0_i32_1 = arith.constant 0 : i32
    return %c0_i32, %c0_i32_0 : i32, i32
  }
  func.func @transform_6(%arg0: i32, %arg1: i32) -> (i32, i32) {
    %c0_i32 = arith.constant 0 : i32
    %c0_i32_0 = arith.constant 0 : i32
    %c0_i32_1 = arith.constant 0 : i32
    return %c0_i32, %c0_i32_0 : i32, i32
  }
  func.func @transform_7(%arg0: i32, %arg1: i32) -> (i32, i32, i32) {
    %c0_i32 = arith.constant 0 : i32
    %c0_i32_0 = arith.constant 0 : i32
    return %arg0, %c0_i32, %arg1 : i32, i32, i32
  }
}

</mosaic_0001>

<bundles_post_ra>
// kernel: discriminator_forward.3
= control target key start
LH: loop header
LB: loop body
LE: loop exit
PB: predicated region body
PF: predicated region fallthrough
CT: control target
= control target key end

     0   :  { %s856_s26 = smov 0   ;;  %s858_s27 = smov 0   ;;  %s936_s0 = inlined_call_operand.vmem [shape: f32[2,4,256], index: 0, kind: input, shape index: {}]   ;;  %s937_s1 = inlined_call_operand.vmem [shape: f32[8,4], index: 1, kind: input, shape index: {}]   ;;  %s938_s2 = inlined_call_operand.vmem [shape: f32[8,1], index: 2, kind: input, shape index: {}]   ;;  %s939_s3 = inlined_call_operand.vmem [shape: f32[16,8], index: 3, kind: input, shape index: {}]   ;;  %s940_s4 = inlined_call_operand.vmem [shape: f32[16,1], index: 4, kind: input, shape index: {}]   ;;  %s941_s5 = inlined_call_operand.vmem [shape: f32[1,16], index: 5, kind: input, shape index: {}]   ;;  %s942_s6 = inlined_call_operand.<no memory space> [shape: f32[1,1], index: 6, kind: input, shape index: {}]   ;;  %s943_s7 = inlined_call_operand.vmem [shape: f32[2,1,256], index: 7, kind: output, shape index: {}]  }
   0x1   :  { %v12_v0 = vstv %s942_s6  ;;  %s860_s28 = smov 0   ;;  %s862_s29 = smov 0  }
   0x2   :  { %13 = vst [vmem:[#allocation2] sm:$0x1] %v12_v0  ;;  %s864_s30 = smov 0  }
   0x3 LB: > { %s28_s6 = sadd.s32 1, %s799_s28  ;;  %s31_s8 = sadd.s32 1, %s803_s29  ;;  %s807_s30 = sphi %s864_s30, %s19_s30   ;;  %s803_s29 = sphi %s862_s29, %s947_s29   ;;  %s799_s28 = sphi %s860_s28, %s946_s28   ;;  %s795_s27 = sphi %s858_s27, %s945_s27   ;;  %s791_s26 = sphi %s856_s26, %s944_s26  }
   0x4   : > { %p29_p0 = scmp.ge.s32.totalorder %s28_s6, 2  ;;  %p680_p1 = scmp.ge.s32.totalorder %s807_s30, 1 }
   0x5   : > { %p258_p2 = scmp.lt.s32.totalorder %s807_s30, 5 }
   0x6   : > { %s949_s6 = smov (%p29_p0, %s28_s6), 0  ;;  %s951_s8 = smov (!%p29_p0, %s31_s8), %s803_s29 }
   0x7   : > { %p259_p3 = pnand %p680_p1, %p258_p2  ;;  %p33_p4 = scmp.ge.s32.totalorder %s951_s8, 2 }
   0x8   : > { %p295_p5 = scmp.lt.s32.totalorder (!%p259_p3), %s795_s27, 1  ;;  %p297_p6 = scmp.lt.s32.totalorder (!%p259_p3), %s791_s26, 1  ;;  %v809_v1 = vmov (!%p259_p3), 0.0   ;;  %vm810_vm0 = vmmov (!%p259_p3), 0   ;;  %v312_v2 = vld [vmem:[%s938_s2] sm:$0xff] (!%p259_p3)  ;;  %v811_v3 = vmov (!%p259_p3), 0   ;;  %v508_v30 = vlaneseq (!%p259_p3) }
   0x9   : > { %s953_s8 = smov (%p33_p4, %s951_s8), 0  ;;  %262 = sbr.rel (%p259_p3) target bundleno = 713 (0x2c9), region = 48 }
   0xa   : > { %699 = vmatprep.subr.mxu0 (!%p259_p3), %v809_v1  ;;  %701 = vmatprep.mubr.msk.f32.mxu0 (!%p259_p3), %vm810_vm0, %v809_v1  ;;  %v401_v4 = vld [vmem:[%s940_s4] sm:$0xff] (!%p259_p3)  ;;  %vm322_vm1 = vcmask (!%p259_p3), 1043456   ;;  %vm318_vm2 = vcmask (!%p259_p3), 31744   ;;  %vm413_vm3 = vcmask (!%p259_p3), 64512   ;;  %v402_v8 = vld [vmem:[%s940_s4 + $0x8] sm:$0xff] (!%p259_p3)  ;;  %v812_v17 = vmov (!%p259_p3), 0.0|0.0  }
   0xb   : > { %763 = vset.pattern.permute.xlu0 (!%p259_p3), %v811_v3  ;;  %764 = vset.pattern.permute.xlu1 (!%p259_p3), %v811_v3  ;;  %v311_v5 = vld [vmem:[%s937_s1] sm:$0xff] (!%p259_p3)  ;;  %v400_v16 = vld [vmem:[%s939_s3 + $0x8] sm:$0xff] (!%p259_p3)  ;;  %vm512_vm7 = vcmask (!%p259_p3), 130048   ;;  %v509_v31 = vshrl.u32 (!%p259_p3), %v508_v30, 7 }
   0xc   : > { %315 = vperm.xlu0 (!%p259_p3), %763, %v312_v2   ;;  %v399_v7 = vld [vmem:[%s939_s3] sm:$0xff] (!%p259_p3)  ;;  %410 = vperm.xlu1 (!%p259_p3), %764, %v402_v8  }
   0xd   : > { %706 = vmatprep.mubr.msk.f32.mxu1 (!%p259_p3), %vm413_vm3, %v399_v7  ;;  %v502_v9 = vld [vmem:[#allocation2] sm:$0x1] (!%p259_p3)  ;;  %v510_v32 = vsub.s32 (!%p259_p3), 0, %v509_v31 }
   0xe   : > { %v501_v29 = vld [vmem:[%s941_s5] sm:$0x1] (!%p259_p3) }
  0x10   : > { %s955_s27 = smov (!%p295_p5, %s795_s27), 1  ;;  %s957_s26 = smov (!%p297_p6, %s791_s26), 1  ;;  %405 = vperm.xlu0 %763, %v401_v4   ;;  %505 = vperm.xlu1 %764, %v502_v9  }
  0x11   : > { %s681_s11 = sshll.u32 %s955_s27, 1 }
  0x12   : > { %s893_s14 = sadd.s32 %s681_s11, %s957_s26 }
  0x13   : > { %s682_s15 = sshll.u32 %s893_s14, 2  ;;  %s309_s12 = scalar_lea.vmem %s943_s7, %s893_s14 }
  0x14   : > { %s302_s18 = scalar_lea.vmem %s936_s0, %s682_s15 }
  0x15   : > { %v310_v6 = vld [vmem:[%s302_s18] sm:$0xf] }
  0x16   : > { %700 = vmatpush3.msk.msra.mxu0 %vm322_vm1, %v310_v6 }
  0x17   : > { %702 = vmatmul.mubr.msk.f32.vlgmr.msra.gmra.mrb[0].mxu0 %vm318_vm2, %v311_v5  ;;  %716 = vmatprep.subr.bf16.mxu0 %v812_v17 }
  0x18   : > { %713 = vmatprep.mubr.msk.f32.mxu0 %vm810_vm0, %v809_v1 }
  0x8b   : > { %v316_v10 = vpop.permute.xlu0 %315  ;;  %v411_v18 = vpop.permute.xlu1 %410 }
  0x8f   : > { %v406_v20 = vpop.permute.xlu0 %405  ;;  %v506_v33 = vpop.permute.xlu1 %505 }
  0x90   : > { %v511_v34 = vrot.slane %v506_v33, %v510_v32 }
  0xea   : > { %v392_v11 = vpop.f32.mrb[0].mxu0 }
  0xeb   : > { %v393_v12 = vadd.f32 %v392_v11, %v316_v10  ;;  %v703_v13 = vpop.f32.mrb[1].mxu0 }
  0xed   : > { %vm396_vm4 = vcmp.gt.f32.partialorder %v393_v12, 0.0  ;;  %v397_v14 = vmul.f32 0.2, %v393_v12 }
  0xef   : > { %v398_v15 = vsel %vm396_vm4, %v393_v12, %v397_v14 }
  0xf0   : > { %704 = vmatprep.subr.mxu1 %v398_v15 }
  0xf1   : > { %705 = vmatpush3.msra.mxu1 %v398_v15 }
  0xf2   : > { %707 = vmatmul.mubr.msk.f32.vlgmr.msra.gmra.mrb[0].mxu1 %vm413_vm3, %v400_v16 }
 0x1c5   : > { %v708_v19 = vpop.f32.mrb[0].mxu1 }
 0x1c6   : > { %v492_v21 = vadd.f32 %v708_v19, %v411_v18  ;;  %v486_v22 = vpop.f32.mrb[1].mxu1 }
 0x1c7   : > { %v487_v23 = vadd.f32 %v486_v22, %v406_v20 }
 0x1c8   : > { %vm496_vm5 = vcmp.gt.f32.partialorder %v492_v21, 0.0  ;;  %v498_v24 = vmul.f32 0.2, %v492_v21 }
 0x1c9   : > { %vm495_vm6 = vcmp.gt.f32.partialorder %v487_v23, 0.0  ;;  %v497_v25 = vmul.f32 0.2, %v487_v23 }
 0x1ca   : > { %v500_v26 = vsel %vm496_vm5, %v492_v21, %v498_v24 }
 0x1cb   : > { %v499_v27 = vsel %vm495_vm6, %v487_v23, %v497_v25 }
 0x1cc   : > { %v717_v28 = vpack.c.bf16 %v500_v26, %v499_v27 }
 0x1ce   : > { %718 = vmatpush3.bf16.msra.mxu0 %v717_v28 }
 0x1d1   : > { %714 = vmatmul.mubr.msk.f32.vlgmr.msra.gmra.mrb[2].mxu0 %vm512_vm7, %v501_v29 }
 0x2a4   : > { %v582_v35 = vpop.f32.mrb[2].mxu0 }
 0x2a5   : > { %v583_v36 = vadd.f32 %v582_v35, %v511_v34  ;;  %v715_v37 = vpop.f32.mrb[3].mxu0 }
 0x2a7   : > { %v586_v38 = vand.u32 2147483647, %v583_v36  ;;  %vm592_vm8 = vcmp.ge.f32.partialorder %v583_v36, 0.0 }
 0x2a9   : > { %v587_v39 = vsub.f32 0.0, %v586_v38 }
 0x2ab   : > { %v588_v40 = vmul.f32 1.442695, %v587_v39 }
 0x2ad   : > { %765 = vpow2.f32 %v588_v40 }
 0x2b7   : > { %v766_v41 = vpop.eup %765 }
 0x2b8   : > { %v590_v42 = vadd.f32 1.0, %v766_v41 }
 0x2ba   : > { %767 = vrcp.f32 %v590_v42 }
 0x2c4   : > { %v768_v43 = vpop.eup %767 }
 0x2c5   : > { %v593_v44 = vsub.f32 1.0, %v768_v43 }
 0x2c7   : > { %v594_v45 = vsel %vm592_vm8, %v768_v43, %v593_v44 }
 0x2c8   : > { %595 = vst [vmem:[%s309_s12] sm:$0x1] %v594_v45 }
 0x2c9 PF: > { %s19_s30 = sadd.s32 1, %s807_s30   ;;  %s944_s26 = smov %s799_s28 }
 0x2ca   : > { %p16_p7 = scmp.ge.s32.totalorder %s19_s30, 6   ;;  %s945_s27 = smov %s803_s29 }
 0x2cb   : > { %s946_s28 = smov %s949_s6  ;;  %s947_s29 = smov %s953_s8 }
 0x2cc   :  { %18 = sbr.rel (!%p16_p7) target bundleno = 3 (0x3), region = 78 }

// kernel: discriminator_forward.2
= control target key start
LH: loop header
LB: loop body
LE: loop exit
PB: predicated region body
PF: predicated region fallthrough
CT: control target
= control target key end

     0   :  { %s688_s18 = smov 0   ;;  %s690_s19 = smov 0   ;;  %s769_s0 = inlined_call_operand.vmem [shape: f32[2,4,256], index: 0, kind: input, shape index: {}]   ;;  %s770_s1 = inlined_call_operand.vmem [shape: f32[8,4], index: 1, kind: input, shape index: {}]   ;;  %s771_s2 = inlined_call_operand.vmem [shape: f32[8,1], index: 2, kind: input, shape index: {}]   ;;  %s772_s3 = inlined_call_operand.vmem [shape: f32[16,8], index: 3, kind: input, shape index: {}]   ;;  %s773_s4 = inlined_call_operand.vmem [shape: f32[16,1], index: 4, kind: input, shape index: {}]   ;;  %s774_s5 = inlined_call_operand.vmem [shape: f32[2,16,2], index: 5, kind: output, shape index: {}]  }
   0x1   :  { %s692_s20 = smov 0   ;;  %s694_s21 = smov 0  }
   0x2   :  { %s696_s22 = smov 0  }
   0x3 LB: > { %s24_s23 = sadd.s32 1, %s644_s20  ;;  %s27_s24 = sadd.s32 1, %s648_s21  ;;  %s652_s22 = sphi %s696_s22, %s15_s22   ;;  %s648_s21 = sphi %s694_s21, %s778_s21   ;;  %s644_s20 = sphi %s692_s20, %s777_s20   ;;  %s640_s19 = sphi %s690_s19, %s776_s19   ;;  %s636_s18 = sphi %s688_s18, %s775_s18  }
   0x4   : > { %p25_p0 = scmp.ge.s32.totalorder %s24_s23, 2  ;;  %p540_p1 = scmp.ge.s32.totalorder %s652_s22, 1 }
   0x5   : > { %p204_p2 = scmp.lt.s32.totalorder %s652_s22, 5 }
   0x6   : > { %s780_s23 = smov (%p25_p0, %s24_s23), 0  ;;  %s782_s24 = smov (!%p25_p0, %s27_s24), %s648_s21 }
   0x7   : > { %p205_p3 = pnand %p540_p1, %p204_p2  ;;  %p29_p4 = scmp.ge.s32.totalorder %s782_s24, 2 }
   0x8   : > { %p235_p5 = scmp.lt.s32.totalorder (!%p205_p3), %s640_s19, 1  ;;  %p237_p6 = scmp.lt.s32.totalorder (!%p205_p3), %s636_s18, 1 }
   0x9   : > { %s784_s24 = smov (%p29_p4, %s782_s24), 0  ;;  %208 = sbr.rel (%p205_p3) target bundleno = 615 (0x267), region = 40 }
   0xa   : > { %p545_p7 = scmp.ne.s32.totalorder (!%p205_p3), %s636_s18, 0 }
  0x10   : > { %s786_s19 = smov (!%p235_p5, %s640_s19), 1  ;;  %251 = sbr.rel (%p545_p7) target bundleno = 23 (0x17), region = 44 }
  0x11   : > { %s238_s25 = scalar_select %p237_p6, %s636_s18, 1 }
  0x12   : > { %s541_s26 = sshll.u32 %s786_s19, 1  ;;  %s552_s27 = sshll.u32 %s786_s19, 4  ;;  %vm252_vm0 = vcmask (!%p545_p7), 15360   ;;  %v654_v0 = vmov (!%p545_p7), 0.0  }
  0x13   : > { %s240_s28 = sadd.s32 %s541_s26, %s238_s25  ;;  %s721_s6 = scalar_lea.vmem %s774_s5, %s552_s27 }
  0x14   : > { %s542_s7 = sshll.u32 %s240_s28, 2  ;;  %253 = vst.msk [vmem:[%s721_s6] sm:$0xff] (!%p545_p7), %vm252_vm0, %v654_v0  ;;  %254 = vst.msk [vmem:[%s721_s6 + $0x8] sm:$0xff] (!%p545_p7), %vm252_vm0, %v654_v0 }
  0x15   : > { %s242_s10 = scalar_lea.vmem %s769_s0, %s542_s7 }
  0x17 PF: > { %v255_v1 = vld [vmem:[%s242_s10] sm:$0xf]  ;;  %vm267_vm1 = vcmask 1043456   ;;  %v655_v3 = vmov 0.0   ;;  %vm656_vm2 = vmmov 0   ;;  %vm263_vm3 = vcmask 31744  }
  0x18   : > { %v256_v2 = vld [vmem:[%s770_s1] sm:$0xff]  ;;  %558 = vmatprep.subr.mxu0 %v655_v3  ;;  %560 = vmatprep.mubr.msk.f32.mxu0 %vm656_vm2, %v655_v3  ;;  %v657_v5 = vmov 0   ;;  %vm358_vm4 = vcmask 64512   ;;  %v347_v8 = vld [vmem:[%s773_s4 + $0x8] sm:$0xff]  ;;  %vm448_vm6 = vcmask 7168   ;;  %vm461_vm7 = vcmask 15368  }
  0x19   : > { %v257_v4 = vld [vmem:[%s771_s2] sm:$0xff]  ;;  %559 = vmatpush3.msk.msra.mxu0 %vm267_vm1, %v255_v1  ;;  %612 = vset.pattern.permute.xlu0 %v657_v5  ;;  %v345_v15 = vld [vmem:[%s772_s3 + $0x8] sm:$0xff] }
  0x1a   : > { %561 = vmatmul.mubr.msk.f32.vlgmr.msra.gmra.mrb[0].mxu0 %vm263_vm3, %v256_v2  ;;  %260 = vperm.xlu0 %612, %v257_v4   ;;  %v346_v6 = vld [vmem:[%s773_s4] sm:$0xff] }
  0x1b   : > { %613 = vset.pattern.permute.xlu1 %v657_v5  ;;  %v344_v7 = vld [vmem:[%s772_s3] sm:$0xff]  ;;  %v441_v24 = vld [vmem:[%s721_s6 + $0x8] sm:$0xff] }
  0x1c   : > { %565 = vmatprep.mubr.msk.f32.mxu1 %vm358_vm4, %v344_v7  ;;  %355 = vperm.xlu1 %613, %v347_v8   ;;  %v440_v25 = vld [vmem:[%s721_s6] sm:$0xff] }
  0x1e   : > { %350 = vperm.xlu0 %612, %v346_v6  }
  0x99   : > { %v261_v9 = vpop.permute.xlu0 %260 }
  0x9b   : > { %v356_v16 = vpop.permute.xlu1 %355 }
  0x9d   : > { %v351_v18 = vpop.permute.xlu0 %350 }
  0xed   : > { %v337_v10 = vpop.f32.mrb[0].mxu0 }
  0xee   : > { %v338_v11 = vadd.f32 %v337_v10, %v261_v9  ;;  %v562_v12 = vpop.f32.mrb[1].mxu0 }
  0xf0   : > { %vm341_vm5 = vcmp.gt.f32.partialorder %v338_v11, 0.0  ;;  %v342_v13 = vmul.f32 0.2, %v338_v11 }
  0xf2   : > { %v343_v14 = vsel %vm341_vm5, %v338_v11, %v342_v13 }
  0xf3   : > { %563 = vmatprep.subr.mxu1 %v343_v14 }
  0xf4   : > { %564 = vmatpush3.msra.mxu1 %v343_v14 }
  0xf5   : > { %566 = vmatmul.mubr.msk.f32.vlgmr.msra.gmra.mrb[0].mxu1 %vm358_vm4, %v345_v15 }
 0x1c8   : > { %v567_v17 = vpop.f32.mrb[0].mxu1 }
 0x1c9   : > { %v437_v19 = vadd.f32 %v567_v17, %v356_v16  ;;  %v431_v20 = vpop.f32.mrb[1].mxu1 }
 0x1ca   : > { %v432_v21 = vadd.f32 %v431_v20, %v351_v18 }
 0x1cb   : > { %444 = vadd.xlane.f32.xlu0 %v437_v19  ;;  %v454_v23 = vmul.f32 %v437_v19, %v437_v19 }
 0x1cc   : > { %442 = vadd.xlane.f32.xlu1 %v432_v21  ;;  %v453_v22 = vmul.f32 %v432_v21, %v432_v21 }
 0x1cf   : > { %455 = vadd.xlane.f32.xlu0 %v453_v22 }
 0x1d0   : > { %457 = vadd.xlane.f32.xlu1 %v454_v23 }
 0x258   : > { %v445_v26 = vpop.xlane.xlu0 %444 }
 0x259   : > { %v447_v27 = vadd.f32 %v445_v26, %v441_v24  ;;  %v443_v28 = vpop.xlane.xlu1 %442 }
 0x25a   : > { %v446_v29 = vadd.f32 %v443_v28, %v440_v25 }
 0x25b   : > { %450 = vst.msk [vmem:[%s721_s6 + $0x8] sm:$0xff] %vm448_vm6, %v447_v27 }
 0x25c   : > { %449 = vst.msk [vmem:[%s721_s6] sm:$0xff] %vm448_vm6, %v446_v29  ;;  %v456_v33 = vpop.xlane.xlu0 %455 }
 0x25d   : > { %v458_v31 = vpop.xlane.xlu1 %457 }
 0x262   : > { %v452_v30 = vld [vmem:[%s721_s6 + $0x8] sm:$0xff] }
 0x263   : > { %v451_v32 = vld [vmem:[%s721_s6] sm:$0xff]  ;;  %v460_v34 = vadd.f32 %v458_v31, %v452_v30 }
 0x264   : > { %v459_v35 = vadd.f32 %v456_v33, %v451_v32 }
 0x265   : > { %463 = vst.msk [vmem:[%s721_s6 + $0x8] sm:$0xff] %vm461_vm7, %v460_v34 }
 0x266   : > { %462 = vst.msk [vmem:[%s721_s6] sm:$0xff] %vm461_vm7, %v459_v35 }
 0x267 PF: > { %s15_s22 = sadd.s32 1, %s652_s22   ;;  %s775_s18 = smov %s644_s20 }
 0x268   : > { %p12_p8 = scmp.ge.s32.totalorder %s15_s22, 6   ;;  %s776_s19 = smov %s648_s21 }
 0x269   : > { %s777_s20 = smov %s780_s23  ;;  %s778_s21 = smov %s784_s24 }
 0x26a   :  { %14 = sbr.rel (!%p12_p8) target bundleno = 3 (0x3), region = 74 }

</bundles_post_ra>
